<compile_context>
chip_gen: v7x
topology: tpu7x:2x2x1
jax: 0.10.0
libtpu: 0.0.40
codegen_flags: <defaults>
</compile_context>

<pallas_src>
import functools

import jax
import jax.numpy as jnp
from jax.experimental import pallas as pl
from jax.experimental.pallas import tpu as pltpu

_NEG_BIG = -1e30  # finite stand-in for -inf (avoids NaN from inf - inf)


def _ohem_partials_kernel(x_ref, t_ref,
                          m_out, l_out, ts_out, txs_out,
                          m_acc, l_acc, ts_acc, txs_acc,
                          *, nw, tn, mask_tail):
    """Streams (R, TN) tiles of logits/targets and keeps element-wise running
    accumulators; emits per-row partial (max, expsum, t_sum, t*x sum)."""
    pid = pl.program_id(0)
    nsteps = pl.num_programs(0)

    x = x_ref[...].astype(jnp.float32)   # (R, TN) logits
    t = t_ref[...].astype(jnp.float32)   # (R, TN) soft targets

    if mask_tail:  # static Python flag: only emitted when NW % TN != 0
        col = pid * tn + jax.lax.broadcasted_iota(jnp.int32, x.shape, 1)
        valid = col < nw
        x = jnp.where(valid, x, _NEG_BIG)
        t = jnp.where(valid, t, 0.0)

    @pl.when(pid == 0)
    def _():
        m_acc[...] = jnp.full_like(m_acc, _NEG_BIG)
        l_acc[...] = jnp.zeros_like(l_acc)
        ts_acc[...] = jnp.zeros_like(ts_acc)
        txs_acc[...] = jnp.zeros_like(txs_acc)

    # Element-wise online logsumexp update (VPU + EUP only, no XLU per tile).
    m_old = m_acc[...]
    m_new = jnp.maximum(m_old, x)
    l_acc[...] = l_acc[...] * jnp.exp(m_old - m_new) + jnp.exp(x - m_new)
    m_acc[...] = m_new
    ts_acc[...] = ts_acc[...] + t
    txs_acc[...] = txs_acc[...] + t * x

    # Single cross-lane reduce on the last tile.
    @pl.when(pid == nsteps - 1)
    def _():
        m_vec = m_acc[...]
        row_max = jnp.max(m_vec, axis=-1, keepdims=True)                 # (R, 1)
        m_out[...] = row_max
        l_out[...] = jnp.sum(l_acc[...] * jnp.exp(m_vec - row_max),
                             axis=-1, keepdims=True)                     # (R, 1)
        ts_out[...] = jnp.sum(ts_acc[...], axis=-1, keepdims=True)       # (R, 1)
        txs_out[...] = jnp.sum(txs_acc[...], axis=-1, keepdims=True)     # (R, 1)


def ohem_loss(inputs, targets, topk_ratio=0.3, *, tile_n=1024):
    """OHEM loss. inputs/targets: (B, C, H, W), any float dtype. Returns f32 scalar."""
    B, C, H, W = inputs.shape
    num_pixels = H * W
    N = C * H * W

    # Fold part of N onto the sublane axis when B < 8 so vregs are full.
    fold = 1
    if B < 8:
        for g in (8, 4, 2):
            if N % g == 0:
                fold = g
                break
    R = B * fold
    NW = N // fold

    # Lane tile along the reduction axis: full width if small, else a multiple of 128.
    tn = NW if NW <= tile_n else tile_n
    num_tiles = pl.cdiv(NW, tn)
    mask_tail = (NW % tn) != 0

    # Keep the native dtype (no f32 pre-cast in the wrapper); reshapes are free.
    x = inputs.reshape(R, NW)
    t = targets.reshape(R, NW)

    kernel = functools.partial(_ohem_partials_kernel,
                               nw=NW, tn=tn, mask_tail=mask_tail)
    part = jax.ShapeDtypeStruct((R, 1), jnp.float32)
    out_block = pl.BlockSpec((R, 1), lambda i: (0, 0))

    m_p, l_p, ts_p, txs_p = pl.pallas_call(
        kernel,
        out_shape=(part, part, part, part),
        grid_spec=pltpu.PrefetchScalarGridSpec(
            num_scalar_prefetch=0,
            grid=(num_tiles,),
            in_specs=[
                pl.BlockSpec((R, tn), lambda i: (0, i)),
                pl.BlockSpec((R, tn), lambda i: (0, i)),
            ],
            out_specs=[out_block, out_block, out_block, out_block],
            scratch_shapes=[pltpu.VMEM((R, tn), jnp.float32) for _ in range(4)],
        ),
        compiler_params=pltpu.CompilerParams(
            dimension_semantics=("arbitrary",),   # reduction axis
        ),
    )(x, t)

    # Recombine the `fold` partial rows of each original sample (tiny O(B*fold) glue).
    m_b = m_p.reshape(B, fold)
    l_b = l_p.reshape(B, fold)
    ts_b = ts_p.reshape(B, fold)
    txs_b = txs_p.reshape(B, fold)

    row_max = jnp.max(m_b, axis=-1)                                       # (B,)
    lse = row_max + jnp.log(jnp.sum(l_b * jnp.exp(m_b - row_max[:, None]), axis=-1))
    t_sum = jnp.sum(ts_b, axis=-1)
    tx_sum = jnp.sum(txs_b, axis=-1)
    losses = lse * t_sum - tx_sum                                         # (B,)

    k = int(topk_ratio * num_pixels)
    if k > B:
        k = B
    # TODO(synk): k == 0 (H*W < 1/topk_ratio) gives mean of an empty top-k (NaN),
    # matching the PyTorch behaviour; not special-cased.
    if k >= B:
        return jnp.mean(losses)          # top-k of everything == plain mean
    top_vals, _ = jax.lax.top_k(losses, k)
    return jnp.mean(top_vals)


def _ohem_loss_ref(inputs, targets, topk_ratio=0.3):
    """Pure-JAX reference for correctness checking."""
    B, C, H, W = inputs.shape
    num_pixels = H * W
    x = inputs.reshape(B, -1).astype(jnp.float32)
    t = targets.reshape(B, -1).astype(jnp.float32)
    logp = jax.nn.log_softmax(x, axis=-1)
    losses = -jnp.sum(t * logp, axis=-1)
    k = min(int(topk_ratio * num_pixels), losses.size)
    top_vals, _ = jax.lax.top_k(losses, k)
    return jnp.mean(top_vals)


def _make_case(key, shape, dtype=jnp.float32):
    k1, k2 = jax.random.split(key)
    B = shape[0]
    x = jax.random.normal(k1, shape, dtype=jnp.float32)
    t = jax.nn.softmax(
        jax.random.normal(k2, shape, dtype=jnp.float32).reshape(B, -1), axis=-1
    ).reshape(shape)
    return x.astype(dtype), t.astype(dtype)


if __name__ == "__main__":
    key = jax.random.PRNGKey(0)
    keys = jax.random.split(key, 4)

    cases = [
        # (shape, dtype) — small shapes consistent with the module
        ((2, 4, 16, 16), jnp.float32),   # N=1024, single tile after sublane fold
        ((2, 4, 64, 64), jnp.float32),   # N=16384 -> 2 lane tiles (online path)
        ((2, 3, 64, 64), jnp.float32),   # N=12288 -> ragged last tile (mask path)
        ((2, 4, 16, 16), jnp.bfloat16),  # native bf16 inputs, f32 accumulation
    ]

    for ck, (shape, dtype) in zip(keys, cases):
        inputs, targets = _make_case(ck, shape, dtype)
        out = ohem_loss(inputs, targets, topk_ratio=0.3)
        out = jax.block_until_ready(out)
        ref = _ohem_loss_ref(inputs, targets, topk_ratio=0.3)
        assert jnp.allclose(out, ref, rtol=1e-4, atol=1e-4), (shape, dtype, out, ref)

    print("KERNEL_OK")
</pallas_src>

<mosaic_0001>
module attributes {stable_mosaic.version = 11 : i64} {
  func.func @_ohem_partials_kernel(%arg0: i32, %arg1: memref<16x128xf32, #tpu.memory_space<vmem>>, %arg2: memref<16x128xf32, #tpu.memory_space<vmem>>, %arg3: memref<16x1xf32, #tpu.memory_space<vmem>>, %arg4: memref<16x1xf32, #tpu.memory_space<vmem>>, %arg5: memref<16x1xf32, #tpu.memory_space<vmem>>, %arg6: memref<16x1xf32, #tpu.memory_space<vmem>>, %arg7: memref<16x128xf32, #tpu.memory_space<vmem>>, %arg8: memref<16x128xf32, #tpu.memory_space<vmem>>, %arg9: memref<16x128xf32, #tpu.memory_space<vmem>>, %arg10: memref<16x128xf32, #tpu.memory_space<vmem>>) attributes {dimension_semantics = [#tpu.dimension_semantics<arbitrary>], iteration_bounds = array<i64: 1>, scalar_prefetch = 0 : i64, scratch_operands = 4 : i64, tpu.core_type = #tpu.core_type<tc>, window_params = [{transform_indices = @transform_0, window_bounds = array<i64: 16, 128>}, {transform_indices = @transform_1, window_bounds = array<i64: 16, 128>}, {pipeline_mode = #tpu.pipeline_mode<synchronous>, transform_indices = @transform_2, window_bounds = array<i64: 16, 1>}, {pipeline_mode = #tpu.pipeline_mode<synchronous>, transform_indices = @transform_3, window_bounds = array<i64: 16, 1>}, {pipeline_mode = #tpu.pipeline_mode<synchronous>, transform_indices = @transform_4, window_bounds = array<i64: 16, 1>}, {pipeline_mode = #tpu.pipeline_mode<synchronous>, transform_indices = @transform_5, window_bounds = array<i64: 16, 1>}]} {
    %c0 = arith.constant 0 : index
    %c0_0 = arith.constant 0 : index
    %0 = vector.load %arg1[%c0, %c0_0] : memref<16x128xf32, #tpu.memory_space<vmem>>, vector<16x128xf32>
    %c0_1 = arith.constant 0 : index
    %c0_2 = arith.constant 0 : index
    %1 = vector.load %arg2[%c0_1, %c0_2] : memref<16x128xf32, #tpu.memory_space<vmem>>, vector<16x128xf32>
    %c0_i32 = arith.constant 0 : i32
    %2 = arith.cmpi eq, %arg0, %c0_i32 : i32
    %3 = arith.extui %2 : i1 to i32
    %c0_i32_3 = arith.constant 0 : i32
    %4 = arith.cmpi ne, %3, %c0_i32_3 : i32
    scf.if %4 {
      %cst = arith.constant -1.000000e+30 : f32
      %26 = vector.broadcast %cst : f32 to vector<16x128xf32>
      %c0_22 = arith.constant 0 : index
      %c0_23 = arith.constant 0 : index
      %27 = vector.load %arg7[%c0_22, %c0_23] : memref<16x128xf32, #tpu.memory_space<vmem>>, vector<16x128xf32>
      tpu.vector_store %arg7[%c0_22, %c0_23], %26 {strides = array<i32>} : memref<16x128xf32, #tpu.memory_space<vmem>>, vector<16x128xf32>,
      %cst_24 = arith.constant 0.000000e+00 : f32
      %28 = vector.broadcast %cst_24 : f32 to vector<16x128xf32>
      %c0_25 = arith.constant 0 : index
      %c0_26 = arith.constant 0 : index
      %29 = vector.load %arg8[%c0_25, %c0_26] : memref<16x128xf32, #tpu.memory_space<vmem>>, vector<16x128xf32>
      tpu.vector_store %arg8[%c0_25, %c0_26], %28 {strides = array<i32>} : memref<16x128xf32, #tpu.memory_space<vmem>>, vector<16x128xf32>,
      %cst_27 = arith.constant 0.000000e+00 : f32
      %30 = vector.broadcast %cst_27 : f32 to vector<16x128xf32>
      %c0_28 = arith.constant 0 : index
      %c0_29 = arith.constant 0 : index
      %31 = vector.load %arg9[%c0_28, %c0_29] : memref<16x128xf32, #tpu.memory_space<vmem>>, vector<16x128xf32>
      tpu.vector_store %arg9[%c0_28, %c0_29], %30 {strides = array<i32>} : memref<16x128xf32, #tpu.memory_space<vmem>>, vector<16x128xf32>,
      %cst_30 = arith.constant 0.000000e+00 : f32
      %32 = vector.broadcast %cst_30 : f32 to vector<16x128xf32>
      %c0_31 = arith.constant 0 : index
      %c0_32 = arith.constant 0 : index
      %33 = vector.load %arg10[%c0_31, %c0_32] : memref<16x128xf32, #tpu.memory_space<vmem>>, vector<16x128xf32>
      tpu.vector_store %arg10[%c0_31, %c0_32], %32 {strides = array<i32>} : memref<16x128xf32, #tpu.memory_space<vmem>>, vector<16x128xf32>,
    } else {
    }
    %c0_4 = arith.constant 0 : index
    %c0_5 = arith.constant 0 : index
    %5 = vector.load %arg7[%c0_4, %c0_5] : memref<16x128xf32, #tpu.memory_space<vmem>>, vector<16x128xf32>
    %6 = arith.maximumf %5, %0 : vector<16x128xf32>
    %c0_6 = arith.constant 0 : index
    %c0_7 = arith.constant 0 : index
    %7 = vector.load %arg8[%c0_6, %c0_7] : memref<16x128xf32, #tpu.memory_space<vmem>>, vector<16x128xf32>
    %8 = arith.subf %5, %6 : vector<16x128xf32>
    %9 = math.exp %8 : vector<16x128xf32>
    %10 = arith.mulf %7, %9 : vector<16x128xf32>
    %11 = arith.subf %0, %6 : vector<16x128xf32>
    %12 = math.exp %11 : vector<16x128xf32>
    %13 = arith.addf %10, %12 : vector<16x128xf32>
    %c0_8 = arith.constant 0 : index
    %c0_9 = arith.constant 0 : index
    %14 = vector.load %arg8[%c0_8, %c0_9] : memref<16x128xf32, #tpu.memory_space<vmem>>, vector<16x128xf32>
    tpu.vector_store %arg8[%c0_8, %c0_9], %13 {strides = array<i32>} : memref<16x128xf32, #tpu.memory_space<vmem>>, vector<16x128xf32>,
    %c0_10 = arith.constant 0 : index
    %c0_11 = arith.constant 0 : index
    %15 = vector.load %arg7[%c0_10, %c0_11] : memref<16x128xf32, #tpu.memory_space<vmem>>, vector<16x128xf32>
    tpu.vector_store %arg7[%c0_10, %c0_11], %6 {strides = array<i32>} : memref<16x128xf32, #tpu.memory_space<vmem>>, vector<16x128xf32>,
    %c0_12 = arith.constant 0 : index
    %c0_13 = arith.constant 0 : index
    %16 = vector.load %arg9[%c0_12, %c0_13] : memref<16x128xf32, #tpu.memory_space<vmem>>, vector<16x128xf32>
    %17 = arith.addf %16, %1 : vector<16x128xf32>
    %c0_14 = arith.constant 0 : index
    %c0_15 = arith.constant 0 : index
    %18 = vector.load %arg9[%c0_14, %c0_15] : memref<16x128xf32, #tpu.memory_space<vmem>>, vector<16x128xf32>
    tpu.vector_store %arg9[%c0_14, %c0_15], %17 {strides = array<i32>} : memref<16x128xf32, #tpu.memory_space<vmem>>, vector<16x128xf32>,
    %c0_16 = arith.constant 0 : index
    %c0_17 = arith.constant 0 : index
    %19 = vector.load %arg10[%c0_16, %c0_17] : memref<16x128xf32, #tpu.memory_space<vmem>>, vector<16x128xf32>
    %20 = arith.mulf %1, %0 : vector<16x128xf32>
    %21 = arith.addf %19, %20 : vector<16x128xf32>
    %c0_18 = arith.constant 0 : index
    %c0_19 = arith.constant 0 : index
    %22 = vector.load %arg10[%c0_18, %c0_19] : memref<16x128xf32, #tpu.memory_space<vmem>>, vector<16x128xf32>
    tpu.vector_store %arg10[%c0_18, %c0_19], %21 {strides = array<i32>} : memref<16x128xf32, #tpu.memory_space<vmem>>, vector<16x128xf32>,
    %c0_i32_20 = arith.constant 0 : i32
    %23 = arith.cmpi eq, %arg0, %c0_i32_20 : i32
    %24 = arith.extui %23 : i1 to i32
    %c0_i32_21 = arith.constant 0 : i32
    %25 = arith.cmpi ne, %24, %c0_i32_21 : i32
    scf.if %25 {
      %c0_22 = arith.constant 0 : index
      %c0_23 = arith.constant 0 : index
      %26 = vector.load %arg7[%c0_22, %c0_23] : memref<16x128xf32, #tpu.memory_space<vmem>>, vector<16x128xf32>
      %cst = arith.constant dense<0xFF800000> : vector<16xf32>
      %27 = vector.multi_reduction <maximumf>, %26, %cst [1] : vector<16x128xf32> to vector<16xf32>
      %28 = vector.shape_cast %27 : vector<16xf32> to vector<16x1xf32>
      %c0_24 = arith.constant 0 : index
      %c0_25 = arith.constant 0 : index
      %29 = vector.load %arg3[%c0_24, %c0_25] : memref<16x1xf32, #tpu.memory_space<vmem>>, vector<16x1xf32>
      tpu.vector_store %arg3[%c0_24, %c0_25], %28 {strides = array<i32>} : memref<16x1xf32, #tpu.memory_space<vmem>>, vector<16x1xf32>,
      %c0_26 = arith.constant 0 : index
      %c0_27 = arith.constant 0 : index
      %30 = vector.load %arg8[%c0_26, %c0_27] : memref<16x128xf32, #tpu.memory_space<vmem>>, vector<16x128xf32>
      %31 = vector.broadcast %28 : vector<16x1xf32> to vector<16x128xf32>
      %32 = arith.subf %26, %31 : vector<16x128xf32>
      %33 = math.exp %32 : vector<16x128xf32>
      %34 = arith.mulf %30, %33 : vector<16x128xf32>
      %cst_28 = arith.constant dense<0.000000e+00> : vector<16xf32>
      %35 = vector.multi_reduction <add>, %34, %cst_28 [1] : vector<16x128xf32> to vector<16xf32>
      %36 = vector.shape_cast %35 : vector<16xf32> to vector<16x1xf32>
      %c0_29 = arith.constant 0 : index
      %c0_30 = arith.constant 0 : index
      %37 = vector.load %arg4[%c0_29, %c0_30] : memref<16x1xf32, #tpu.memory_space<vmem>>, vector<16x1xf32>
      tpu.vector_store %arg4[%c0_29, %c0_30], %36 {strides = array<i32>} : memref<16x1xf32, #tpu.memory_space<vmem>>, vector<16x1xf32>,
      %c0_31 = arith.constant 0 : index
      %c0_32 = arith.constant 0 : index
      %38 = vector.load %arg9[%c0_31, %c0_32] : memref<16x128xf32, #tpu.memory_space<vmem>>, vector<16x128xf32>
      %cst_33 = arith.constant dense<0.000000e+00> : vector<16xf32>
      %39 = vector.multi_reduction <add>, %38, %cst_33 [1] : vector<16x128xf32> to vector<16xf32>
      %40 = vector.shape_cast %39 : vector<16xf32> to vector<16x1xf32>
      %c0_34 = arith.constant 0 : index
      %c0_35 = arith.constant 0 : index
      %41 = vector.load %arg5[%c0_34, %c0_35] : memref<16x1xf32, #tpu.memory_space<vmem>>, vector<16x1xf32>
      tpu.vector_store %arg5[%c0_34, %c0_35], %40 {strides = array<i32>} : memref<16x1xf32, #tpu.memory_space<vmem>>, vector<16x1xf32>,
      %c0_36 = arith.constant 0 : index
      %c0_37 = arith.constant 0 : index
      %42 = vector.load %arg10[%c0_36, %c0_37] : memref<16x128xf32, #tpu.memory_space<vmem>>, vector<16x128xf32>
      %cst_38 = arith.constant dense<0.000000e+00> : vector<16xf32>
      %43 = vector.multi_reduction <add>, %42, %cst_38 [1] : vector<16x128xf32> to vector<16xf32>
      %44 = vector.shape_cast %43 : vector<16xf32> to vector<16x1xf32>
      %c0_39 = arith.constant 0 : index
      %c0_40 = arith.constant 0 : index
      %45 = vector.load %arg6[%c0_39, %c0_40] : memref<16x1xf32, #tpu.memory_space<vmem>>, vector<16x1xf32>
      tpu.vector_store %arg6[%c0_39, %c0_40], %44 {strides = array<i32>} : memref<16x1xf32, #tpu.memory_space<vmem>>, vector<16x1xf32>,
    } else {
    }
    return
  }
  func.func @transform_0(%arg0: i32) -> (i32, i32) {
    %c0_i32 = arith.constant 0 : i32
    %c0_i32_0 = arith.constant 0 : i32
    return %c0_i32, %arg0 : i32, i32
  }
  func.func @transform_1(%arg0: i32) -> (i32, i32) {
    %c0_i32 = arith.constant 0 : i32
    %c0_i32_0 = arith.constant 0 : i32
    return %c0_i32, %arg0 : i32, i32
  }
  func.func @transform_2(%arg0: i32) -> (i32, i32) {
    %c0_i32 = arith.constant 0 : i32
    %c0_i32_0 = arith.constant 0 : i32
    %c0_i32_1 = arith.constant 0 : i32
    return %c0_i32, %c0_i32_0 : i32, i32
  }
  func.func @transform_3(%arg0: i32) -> (i32, i32) {
    %c0_i32 = arith.constant 0 : i32
    %c0_i32_0 = arith.constant 0 : i32
    %c0_i32_1 = arith.constant 0 : i32
    return %c0_i32, %c0_i32_0 : i32, i32
  }
  func.func @transform_4(%arg0: i32) -> (i32, i32) {
    %c0_i32 = arith.constant 0 : i32
    %c0_i32_0 = arith.constant 0 : i32
    %c0_i32_1 = arith.constant 0 : i32
    return %c0_i32, %c0_i32_0 : i32, i32
  }
  func.func @transform_5(%arg0: i32) -> (i32, i32) {
    %c0_i32 = arith.constant 0 : i32
    %c0_i32_0 = arith.constant 0 : i32
    %c0_i32_1 = arith.constant 0 : i32
    return %c0_i32, %c0_i32_0 : i32, i32
  }
}

</mosaic_0001>

<bundles_post_ra>
// kernel: tpu_custom_call.1
= control target key start
LH: loop header
LB: loop body
LE: loop exit
PB: predicated region body
PF: predicated region fallthrough
CT: control target
= control target key end

     0   :  { %11 = vsyncpa [#allocation7], 0  ;;  %s315_s0 = inlined_call_operand.hbm [shape: f32[16,128], index: 0, kind: input, shape index: {}]   ;;  %s316_s1 = inlined_call_operand.hbm [shape: f32[16,128], index: 1, kind: input, shape index: {}]   ;;  %s317_s2 = inlined_call_operand.vmem [shape: f32[16,1], index: 2, kind: output, shape index: {0}]   ;;  %s318_s3 = inlined_call_operand.vmem [shape: f32[16,1], index: 3, kind: output, shape index: {1}]   ;;  %s319_s4 = inlined_call_operand.vmem [shape: f32[16,1], index: 4, kind: output, shape index: {2}]   ;;  %s320_s5 = inlined_call_operand.vmem [shape: f32[16,1], index: 5, kind: output, shape index: {3}]  }
   0x1   :  { %12 = vsyncpa [#allocation9], 0  ;;  %s225_s18 = smov [#allocation6]   ;;  %s177_s22 = scalar_lea.hbm %s315_s0, 256 }
   0x2   :  { %s18_s19 = sshll.u32 %s225_s18, 4  ;;  %p178_p0 = scmp.ne.s32.totalorder %s315_s0, %s177_s22  ;;  %s19_s19 = int_to_ptr.vmem [resolvable:$true] %s18_s19 }
   0x3   :  { %p181_p1 = scmp.lt.u32.totalorder %s177_s22, %s315_s0 }
   0x5   :  { %p183_p2 = pnand %p181_p1, %p178_p0 }
   0x7   :  { %186 = shalt.err (!%p183_p2)
}
   0x8   :  { %s187_s27 = scalar_lea.vmem %s19_s19, 256  ;;  %p192_p4 = scmp.lt.s32.totalorder %s19_s19, %s19_s19 }
   0x9   :  { %p188_p3 = scmp.ne.s32.totalorder %s19_s19, %s187_s27  ;;  %p193_p5 = scmp.lt.s32.totalorder %s187_s27, %s187_s27 }
   0xb   :  { %p194_p6 = por %p193_p5, %p192_p4 }
   0xd   :  { %p195_p7 = pnand %p194_p6, %p188_p3 }
   0xf   :  { %198 = shalt.err (!%p195_p7)
}
  0x10   :  { %s226_s28 = smov 128   ;;  %s227_s29 = smov 8  }
  0x11   :  { %24 = dma.hbm_to_vmem [thread:$0]  %s315_s0, 256, %s19_s19, [#allocation7], %s226_s28, %s226_s28, %s227_s29  }
  0x12   :  { %s228_s7 = smov [#allocation8]   ;;  %s199_s11 = scalar_lea.hbm %s316_s1, 256 }
  0x13   :  { %s30_s8 = sshll.u32 %s228_s7, 4  ;;  %p200_p8 = scmp.ne.s32.totalorder %s316_s1, %s199_s11  ;;  %s31_s8 = int_to_ptr.vmem [resolvable:$true] %s30_s8 }
  0x14   :  { %p203_p9 = scmp.lt.u32.totalorder %s199_s11, %s316_s1 }
  0x16   :  { %p205_p10 = pnand %p203_p9, %p200_p8 }
  0x18   :  { %208 = shalt.err (!%p205_p10)
}
  0x19   :  { %s209_s16 = scalar_lea.vmem %s31_s8, 256  ;;  %p214_p12 = scmp.lt.s32.totalorder %s31_s8, %s31_s8 }
  0x1a   :  { %p210_p11 = scmp.ne.s32.totalorder %s31_s8, %s209_s16  ;;  %p215_p13 = scmp.lt.s32.totalorder %s209_s16, %s209_s16 }
  0x1c   :  { %p216_p0 = por %p215_p13, %p214_p12 }
  0x1e   :  { %p217_p1 = pnand %p216_p0, %p210_p11 }
  0x20   :  { %220 = shalt.err (!%p217_p1)
}
  0x21   :  { %36 = dma.hbm_to_vmem [thread:$0]  %s316_s1, 256, %s31_s8, [#allocation9], %s226_s28, %s226_s28, %s227_s29  }
  0x22   :  { %221 = dma.done.wait [#allocation7], 256  }
  0x23   :  { %222 = vsyncadd [#allocation7], 4294967040 }
  0x24   :  { %223 = dma.done.wait [#allocation9], 256  }
  0x25   :  { %224 = vsyncadd [#allocation9], 4294967040  ;;  %v43_v0 = vld [vmem:[#allocation6] sm:$0xff]  ;;  %v44_v1 = vld [vmem:[#allocation6 + $0x8] sm:$0xff]  ;;  %vm108_vm0 = vcmask 7168  }
  0x26   :  { %v61_v2 = vmax.f32 %v43_v0, -1e+30  ;;  %v62_v3 = vmax.f32 %v44_v1, -1e+30  ;;  %v46_v4 = vld [vmem:[#allocation8 + $0x8] sm:$0xff]  ;;  %v45_v5 = vld [vmem:[#allocation8] sm:$0xff] }
  0x27   :  { %131 = vadd.xlane.f32.xlu1 %v46_v4  ;;  %v93_v6 = vmul.f32 %v45_v5, %v43_v0  ;;  %v94_v7 = vmul.f32 %v46_v4, %v44_v1 }
  0x28   :  { %104 = vmax.xlane.f32.xlu0 %v61_v2  ;;  %v65_v8 = vsub.f32 -1e+30, %v61_v2  ;;  %v73_v9 = vsub.f32 %v43_v0, %v61_v2  ;;  %v66_v11 = vsub.f32 -1e+30, %v62_v3  ;;  %v74_v13 = vsub.f32 %v44_v1, %v62_v3 }
  0x2a   :  { %v67_v10 = vmul.f32 1.442695, %v65_v8  ;;  %v75_v12 = vmul.f32 1.442695, %v73_v9  ;;  %v69_v14 = vmul.f32 1.442695, %v66_v11 }
  0x2b   :  { %v77_v15 = vmul.f32 1.442695, %v74_v13 }
  0x2c   :  { %106 = vmax.xlane.f32.xlu0 %v62_v3  ;;  %165 = vpow2.f32 %v67_v10 }
  0x2d   :  { %167 = vpow2.f32 %v75_v12 }
  0x2e   :  { %169 = vpow2.f32 %v69_v14 }
  0x2f   :  { %171 = vpow2.f32 %v77_v15 }
  0x30   :  { %129 = vadd.xlane.f32.xlu0 %v45_v5 }
  0x34   :  { %137 = vadd.xlane.f32.xlu0 %v93_v6 }
  0x36   :  { %v166_v20 = vpop.eup %165 }
  0x37   :  { %v168_v23 = vpop.eup %167  ;;  %v71_v24 = vmul.f32 0.0, %v166_v20 }
  0x38   :  { %v170_v25 = vpop.eup %169 }
  0x39   :  { %v79_v26 = vadd.f32 %v168_v23, %v71_v24  ;;  %v72_v27 = vmul.f32 0.0, %v170_v25  ;;  %v172_v28 = vpop.eup %171 }
  0x3b   :  { %v80_v31 = vadd.f32 %v172_v28, %v72_v27 }
  0xb4   :  { %v132_v34 = vpop.xlane.xlu1 %131 }
  0xb5   :  { %v105_v16 = vpop.xlane.xlu0 %104  ;;  %134 = vst.msk [vmem:[%s319_s4 + $0x8] sm:$0xff] %vm108_vm0, %v132_v34 }
  0xb6   :  { %109 = vst.msk [vmem:[%s317_s2] sm:$0xff] %vm108_vm0, %v105_v16  ;;  %v113_v17 = vsub.f32 %v61_v2, %v105_v16 }
  0xb8   :  { %v115_v18 = vmul.f32 1.442695, %v113_v17 }
  0xb9   :  { %v107_v19 = vpop.xlane.xlu0 %106 }
  0xba   :  { %173 = vpow2.f32 %v115_v18  ;;  %110 = vst.msk [vmem:[%s317_s2 + $0x8] sm:$0xff] %vm108_vm0, %v107_v19  ;;  %v114_v21 = vsub.f32 %v62_v3, %v107_v19 }
  0xbc   :  { %v117_v22 = vmul.f32 1.442695, %v114_v21 }
  0xbd   :  { %v130_v35 = vpop.xlane.xlu0 %129 }
  0xbe   :  { %175 = vpow2.f32 %v117_v22  ;;  %133 = vst.msk [vmem:[%s319_s4] sm:$0xff] %vm108_vm0, %v130_v35 }
  0xc1   :  { %v138_v36 = vpop.xlane.xlu0 %137 }
  0xc2   :  { %141 = vst.msk [vmem:[%s320_s5] sm:$0xff] %vm108_vm0, %v138_v36 }
  0xc4   :  { %v174_v29 = vpop.eup %173 }
  0xc5   :  { %v119_v30 = vmul.f32 %v174_v29, %v79_v26 }
  0xc7   :  { %121 = vadd.xlane.f32.xlu1 %v119_v30 }
  0xc8   :  { %v176_v32 = vpop.eup %175 }
  0xc9   :  { %v120_v33 = vmul.f32 %v176_v32, %v80_v31 }
  0xcb   :  { %123 = vadd.xlane.f32.xlu1 %v120_v33 }
  0xcf   :  { %139 = vadd.xlane.f32.xlu1 %v94_v7 }
 0x154   :  { %v122_v37 = vpop.xlane.xlu1 %121 }
 0x155   :  { %125 = vst.msk [vmem:[%s318_s3] sm:$0xff] %vm108_vm0, %v122_v37 }
 0x158   :  { %v124_v38 = vpop.xlane.xlu1 %123 }
 0x159   :  { %126 = vst.msk [vmem:[%s318_s3 + $0x8] sm:$0xff] %vm108_vm0, %v124_v38 }
 0x15c   :  { %v140_v39 = vpop.xlane.xlu1 %139 }
 0x15d   :  { %142 = vst.msk [vmem:[%s320_s5 + $0x8] sm:$0xff] %vm108_vm0, %v140_v39 }
 0x15e   :  { %159 = vsyncpa [#allocation7], 1 }
 0x15f   :  { %160 = vsyncpa [#allocation9], 1 }

</bundles_post_ra>
